<compile_context>
chip_gen: v7x
topology: tpu7x:2x2x1
jax: 0.10.0
libtpu: 0.0.40
codegen_flags: <defaults>
</compile_context>

<pallas_src>
import functools

import jax
import jax.numpy as jnp
from jax.experimental import pallas as pl
from jax.experimental.pallas import tpu as pltpu


# ------------------------------ small helpers ------------------------------ #

def _round_up(x, q):
    return ((x + q - 1) // q) * q


def _pick_tile(total, max_tile, quantum):
    """Largest multiple of `quantum` <= max_tile that divides `total`.
    `total` must itself be a multiple of `quantum`."""
    t = max(quantum, (min(max_tile, total) // quantum) * quantum)
    while total % t:
        t -= quantum
    return t


# ------------------------------ Pallas kernels ----------------------------- #

def _conv_bn_stats_kernel(p_ref, w_ref, scale_ref, shift_ref,
                          y_ref, stats_ref, acc_ref,
                          *, m_total, tile_m, apply_affine, do_act):
    """One (tile_m, OCp) tile of the im2col matmul.

    Grid = (M tiles ["parallel"], K tiles ["arbitrary"]).  Accumulation is in
    a VMEM f32 scratch; on the last K step the tile's per-channel sum and
    *centered* sum-of-squares (rows past the true M masked out) are written to
    rows 0/1 of the (8, OCp) stats block, the optional per-channel affine +
    ReLU is applied, and y is emitted in its (possibly narrower) output dtype.

    NOTE: all pl.program_id / pl.num_programs calls are at kernel top level;
    only plain scalar values are captured by the pl.when bodies.
    """
    i = pl.program_id(0)
    k = pl.program_id(1)
    nk = pl.num_programs(1)
    row_base = i * tile_m
    n_valid = jnp.minimum(tile_m, m_total - row_base).astype(jnp.float32)

    @pl.when(k == 0)
    def _init():
        acc_ref[...] = jnp.zeros_like(acc_ref)

    acc_ref[...] += jnp.dot(p_ref[...], w_ref[...],
                            preferred_element_type=jnp.float32)

    @pl.when(k == nk - 1)
    def _epilogue():
        acc = acc_ref[...]                                        # (tile_m, ocp) f32
        row = jax.lax.broadcasted_iota(jnp.int32, acc.shape, 0) + row_base
        valid = row < m_total                                     # mask ragged tile
        ym = jnp.where(valid, acc, 0.0)
        s = jnp.sum(ym, axis=0, keepdims=True)                    # (1, ocp)
        mu = s / n_valid                                          # tile mean
        d = jnp.where(valid, acc - mu, 0.0)
        ssq = jnp.sum(d * d, axis=0, keepdims=True)               # centered SSQ
        rid = jax.lax.broadcasted_iota(jnp.int32, stats_ref.shape, 0)
        stats_ref[...] = (jnp.where(rid == 0, s, 0.0)
                          + jnp.where(rid == 1, ssq, 0.0))

        out = acc
        if apply_affine:                                          # norm=False path
            out = out * scale_ref[...] + shift_ref[...]
        if do_act:
            out = jnp.maximum(out, 0.0)
        y_ref[...] = out.astype(y_ref.dtype)


def _affine_act_kernel(y_ref, scale_ref, shift_ref, o_ref, *, do_act):
    """Tiled, pipelined y * scale + shift (+ ReLU) on the narrow dtype."""
    y = y_ref[...].astype(jnp.float32) * scale_ref[...] + shift_ref[...]
    if do_act:
        y = jnp.maximum(y, 0.0)
    o_ref[...] = y.astype(o_ref.dtype)


# --------------------------------- wrapper --------------------------------- #

def _im2col(x, kh, kw, stride, padding, dilation):
    """x: (N, Cin, H, W) -> patches (N*OH*OW, Cin*KH*KW), plus (OH, OW)."""
    n, cin, h, w = x.shape
    sh = sw = stride
    ph = pw = padding
    dh = dw = dilation
    oh = (h + 2 * ph - dh * (kh - 1) - 1) // sh + 1
    ow = (w + 2 * pw - dw * (kw - 1) - 1) // sw + 1
    xp = jnp.pad(x, ((0, 0), (0, 0), (ph, ph), (pw, pw)))
    rows = []
    for i in range(kh):
        for j in range(kw):
            sl = xp[:, :, i * dh:i * dh + (oh - 1) * sh + 1:sh,
                          j * dw:j * dw + (ow - 1) * sw + 1:sw]   # (N,Cin,OH,OW)
            rows.append(sl)
    patches = jnp.stack(rows, axis=0)                             # (KH*KW,N,Cin,OH,OW)
    patches = jnp.transpose(patches, (1, 3, 4, 2, 0))             # (N,OH,OW,Cin,KH*KW)
    patches = patches.reshape(n * oh * ow, cin * kh * kw)
    return patches, oh, ow


def conv_module_forward(x, params, *, stride=1, padding=0, dilation=1,
                        activate=True, norm=True, eps=1e-5,
                        compute_dtype=jnp.bfloat16, tm=1024, tk=512,
                        vmem_budget=24 * 1024 * 1024):
    """ConvModule forward.  x: (N, Cin, H, W) f32 -> (N, OC, OH, OW) f32."""
    w = params["conv_w"]                    # (OC, Cin, KH, KW)
    b = params.get("conv_b", None)          # (OC,) or None
    gamma = params["bn_w"]                  # (OC,)
    beta = params["bn_b"]                   # (OC,)

    oc, cin, kh, kw = w.shape
    n = x.shape[0]
    f32 = jnp.float32

    # im2col in the compute dtype (bf16 halves the dominant HBM stream).
    patches, oh, ow = _im2col(x.astype(compute_dtype), kh, kw,
                              stride, padding, dilation)
    m, k_dim = patches.shape

    # Lane-dense padding of K and OC to multiples of 128.
    kpad = _round_up(k_dim, 128)
    ocp = _round_up(oc, 128)
    if kpad != k_dim:
        patches = jnp.pad(patches, ((0, 0), (0, kpad - k_dim)))
    w_mat = w.reshape(oc, k_dim).T.astype(compute_dtype)          # (K, OC)
    w_mat = jnp.pad(w_mat, ((0, kpad - k_dim), (0, ocp - oc)))

    in_bytes = jnp.dtype(compute_dtype).itemsize
    y_dtype = compute_dtype                 # narrow intermediate (bf16 default)
    y_bytes = jnp.dtype(y_dtype).itemsize

    # Keep the whole padded K resident when the weight matrix is small enough:
    # its block index is then constant and it is DMA'd exactly once.
    if kpad * ocp * in_bytes <= 4 * 1024 * 1024:
        tile_k = kpad
    else:
        tile_k = _pick_tile(kpad, tk, 128)
    n_k = kpad // tile_k

    q = 16 if in_bytes == 2 else 8          # bf16 packs 16 rows per vreg
    tile_m = min(_round_up(tm, q), _round_up(m, q))

    def _vmem_est(tm_):
        return (2 * tm_ * tile_k * in_bytes          # patches (double-buffered)
                + 2 * tile_k * ocp * in_bytes        # weights
                + tm_ * ocp * 4                      # f32 accumulator scratch
                + 2 * tm_ * ocp * y_bytes            # y output blocks
                + 2 * 8 * ocp * 4 + 4 * ocp * 4)     # stats + scale/shift
    while tile_m > q and _vmem_est(tile_m) > vmem_budget:
        tile_m = _round_up(tile_m // 2, q)
    n_m = -(-m // tile_m)                   # ceil-div, no M padding / copies

    # Per-channel affine to fuse into the conv epilogue when norm=False.
    if norm:
        # Conv bias intentionally dropped: BN's mean subtraction cancels it.
        scale0 = jnp.ones((ocp,), f32)
        shift0 = jnp.zeros((ocp,), f32)
        apply_affine = False
        act_in_conv = False
    else:
        scale0 = jnp.ones((ocp,), f32)
        shift0 = (jnp.pad(b.astype(f32), (0, ocp - oc)) if b is not None
                  else jnp.zeros((ocp,), f32))
        apply_affine = b is not None
        act_in_conv = activate

    conv_kernel = functools.partial(
        _conv_bn_stats_kernel, m_total=m, tile_m=tile_m,
        apply_affine=apply_affine, do_act=act_in_conv)

    conv_cost = pl.CostEstimate(
        flops=2 * m * kpad * ocp,
        transcendentals=0,
        bytes_accessed=(m * kpad * in_bytes + n_m * kpad * ocp * in_bytes
                        + m * ocp * y_bytes + n_m * 8 * ocp * 4))

    y, stats = pl.pallas_call(
        conv_kernel,
        out_shape=(jax.ShapeDtypeStruct((m, ocp), y_dtype),
                   jax.ShapeDtypeStruct((n_m * 8, ocp), f32)),
        grid=(n_m, n_k),
        in_specs=[
            pl.BlockSpec((tile_m, tile_k), lambda i, k: (i, k)),
            pl.BlockSpec((tile_k, ocp), lambda i, k: (k, 0)),
            pl.BlockSpec((1, ocp), lambda i, k: (0, 0)),
            pl.BlockSpec((1, ocp), lambda i, k: (0, 0)),
        ],
        out_specs=(
            pl.BlockSpec((tile_m, ocp), lambda i, k: (i, 0)),
            pl.BlockSpec((8, ocp), lambda i, k: (i, 0)),
        ),
        scratch_shapes=[pltpu.VMEM((tile_m, ocp), f32)],
        compiler_params=pltpu.CompilerParams(
            dimension_semantics=("parallel", "arbitrary")),
        cost_estimate=conv_cost,
    )(patches, w_mat, scale0.reshape(1, ocp), shift0.reshape(1, ocp))

    if norm:
        # Combine per-tile (sum, centered SSQ) with Chan's formula — avoids the
        # E[x^2]-E[x]^2 cancellation.  Tiny (n_m, OCp) math in XLA.
        st = stats.reshape(n_m, 8, ocp)
        s_t = st[:, 0, :]                                   # (n_m, ocp)
        ssq_t = st[:, 1, :]
        counts = [min(tile_m, m - i * tile_m) for i in range(n_m)]
        n_t = jnp.asarray(counts, dtype=f32).reshape(n_m, 1)
        total = jnp.sum(s_t, axis=0)
        mean = total / m
        mu_t = s_t / n_t
        var = (jnp.sum(ssq_t, axis=0)
               + jnp.sum(n_t * (mu_t - mean) ** 2, axis=0)) / m
        inv = jax.lax.rsqrt(var + eps)
        gamma_p = jnp.pad(gamma.astype(f32), (0, ocp - oc))
        beta_p = jnp.pad(beta.astype(f32), (0, ocp - oc))
        bn_scale = gamma_p * inv
        bn_shift = beta_p - mean * bn_scale

        aff_cost = pl.CostEstimate(flops=3 * m * ocp, transcendentals=0,
                                   bytes_accessed=2 * m * ocp * y_bytes)
        y = pl.pallas_call(
            functools.partial(_affine_act_kernel, do_act=activate),
            out_shape=jax.ShapeDtypeStruct((m, ocp), y_dtype),
            grid=(n_m,),
            in_specs=[
                pl.BlockSpec((tile_m, ocp), lambda i: (i, 0)),
                pl.BlockSpec((1, ocp), lambda i: (0, 0)),
                pl.BlockSpec((1, ocp), lambda i: (0, 0)),
            ],
            out_specs=pl.BlockSpec((tile_m, ocp), lambda i: (i, 0)),
            compiler_params=pltpu.CompilerParams(
                dimension_semantics=("parallel",)),
            cost_estimate=aff_cost,
        )(y, bn_scale.reshape(1, ocp), bn_shift.reshape(1, ocp))

    # (M, OCp) -> (N, OH, OW, OCp) -> drop channel padding -> NCHW f32.
    out = y.reshape(n, oh, ow, ocp)[..., :oc].transpose(0, 3, 1, 2).astype(f32)
    return out


# --------------------------------- reference -------------------------------- #

def _reference(x, params, *, stride, padding, dilation, activate, norm,
               eps=1e-5, compute_dtype=jnp.float32):
    # Inputs rounded to compute_dtype (matches the kernel's MXU input dtype),
    # all arithmetic in f32.
    w = params["conv_w"].astype(compute_dtype).astype(jnp.float32)
    xr = x.astype(compute_dtype).astype(jnp.float32)
    y = jax.lax.conv_general_dilated(
        xr, w,
        window_strides=(stride, stride),
        padding=[(padding, padding), (padding, padding)],
        rhs_dilation=(dilation, dilation),
        dimension_numbers=("NCHW", "OIHW", "NCHW"),
    ) + params["conv_b"].reshape(1, -1, 1, 1)
    if norm:
        mean = jnp.mean(y, axis=(0, 2, 3), keepdims=True)
        var = jnp.mean((y - mean) ** 2, axis=(0, 2, 3), keepdims=True)
        y = (y - mean) * jax.lax.rsqrt(var + eps)
        y = y * params["bn_w"].reshape(1, -1, 1, 1) \
              + params["bn_b"].reshape(1, -1, 1, 1)
    if activate:
        y = jnp.maximum(y, 0.0)
    return y


# ----------------------------------- main ----------------------------------- #

if __name__ == "__main__":
    # ConvModule(in_channels=4, out_channels=8, kernel_size=3, stride=1,
    #            padding=1, bias='auto' -> Conv2d has bias)
    N, CIN, H, W = 2, 4, 16, 16
    OC, KH, KW = 8, 3, 3
    STRIDE, PAD, DIL = 1, 1, 1

    key = jax.random.PRNGKey(0)
    k1, k2, k3, k4, k5 = jax.random.split(key, 5)

    params = {
        "conv_w": 0.1 * jax.random.normal(k1, (OC, CIN, KH, KW), jnp.float32),
        "conv_b": 0.1 * jax.random.normal(k2, (OC,), jnp.float32),
        "bn_w": 1.0 + 0.1 * jax.random.normal(k3, (OC,), jnp.float32),
        "bn_b": 0.1 * jax.random.normal(k4, (OC,), jnp.float32),
    }
    x = jax.random.normal(k5, (N, CIN, H, W), jnp.float32)

    # 1) Default bf16 path (bf16 MXU inputs + bf16 intermediate y): sanity vs a
    #    reference with matching input rounding, loose tolerance for bf16 y/out.
    out = conv_module_forward(x, params, stride=STRIDE, padding=PAD,
                              dilation=DIL, activate=True, norm=True)
    out = jax.block_until_ready(out)
    ref = _reference(x, params, stride=STRIDE, padding=PAD, dilation=DIL,
                     activate=True, norm=True, compute_dtype=jnp.bfloat16)
    assert out.shape == (N, OC, H, W), out.shape
    assert bool(jnp.all(jnp.isfinite(out)))
    assert jnp.allclose(out, ref, rtol=5e-2, atol=5e-2), \
        float(jnp.max(jnp.abs(out - ref)))

    # 2) f32 path: tight comparison against the plain f32 reference.
    out32 = conv_module_forward(x, params, stride=STRIDE, padding=PAD,
                                dilation=DIL, activate=True, norm=True,
                                compute_dtype=jnp.float32)
    out32 = jax.block_until_ready(out32)
    ref32 = _reference(x, params, stride=STRIDE, padding=PAD, dilation=DIL,
                       activate=True, norm=True)
    assert jnp.allclose(out32, ref32, rtol=5e-4, atol=5e-4), \
        float(jnp.max(jnp.abs(out32 - ref32)))

    # 3) norm=False exercises the fused bias+ReLU conv epilogue (no 2nd pass).
    out_nb = conv_module_forward(x, params, stride=STRIDE, padding=PAD,
                                 dilation=DIL, activate=True, norm=False,
                                 compute_dtype=jnp.float32)
    out_nb = jax.block_until_ready(out_nb)
    ref_nb = _reference(x, params, stride=STRIDE, padding=PAD, dilation=DIL,
                        activate=True, norm=False)
    assert jnp.allclose(out_nb, ref_nb, rtol=5e-4, atol=5e-4), \
        float(jnp.max(jnp.abs(out_nb - ref_nb)))

    print("KERNEL_OK")
</pallas_src>

<mosaic_0001>
module attributes {stable_mosaic.version = 11 : i64} {
  func.func @_conv_bn_stats_kernel(%arg0: i32, %arg1: i32, %arg2: memref<512x128xbf16, #tpu.memory_space<vmem>>, %arg3: memref<128x128xbf16, #tpu.memory_space<vmem>>, %arg4: memref<1x128xf32, #tpu.memory_space<vmem>>, %arg5: memref<1x128xf32, #tpu.memory_space<vmem>>, %arg6: memref<512x128xbf16, #tpu.memory_space<vmem>>, %arg7: memref<8x128xf32, #tpu.memory_space<vmem>>, %arg8: memref<512x128xf32, #tpu.memory_space<vmem>>) attributes {dimension_semantics = [#tpu.dimension_semantics<parallel>, #tpu.dimension_semantics<arbitrary>], iteration_bounds = array<i64: 1, 1>, scalar_prefetch = 0 : i64, scratch_operands = 1 : i64, tpu.core_type = #tpu.core_type<tc>, window_params = [{transform_indices = @transform_0, window_bounds = array<i64: 512, 128>}, {transform_indices = @transform_1, window_bounds = array<i64: 128, 128>}, {pipeline_mode = #tpu.pipeline_mode<synchronous>, transform_indices = @transform_2, window_bounds = array<i64: 1, 128>}, {pipeline_mode = #tpu.pipeline_mode<synchronous>, transform_indices = @transform_3, window_bounds = array<i64: 1, 128>}, {transform_indices = @transform_4, window_bounds = array<i64: 512, 128>}, {transform_indices = @transform_5, window_bounds = array<i64: 8, 128>}]} {
    %c512_i32 = arith.constant 512 : i32
    %0 = arith.muli %arg0, %c512_i32 : i32
    %c512_i32_0 = arith.constant 512 : i32
    %1 = arith.subi %c512_i32_0, %0 : i32
    %c512_i32_1 = arith.constant 512 : i32
    %2 = arith.minsi %c512_i32_1, %1 : i32
    %3 = arith.sitofp %2 : i32 to f32
    %c0_i32 = arith.constant 0 : i32
    %4 = arith.cmpi eq, %arg1, %c0_i32 : i32
    %5 = arith.extui %4 : i1 to i32
    %c0_i32_2 = arith.constant 0 : i32
    %6 = arith.cmpi ne, %5, %c0_i32_2 : i32
    scf.if %6 {
      %cst_12 = arith.constant 0.000000e+00 : f32
      %16 = vector.broadcast %cst_12 : f32 to vector<512x128xf32>
      %c0_13 = arith.constant 0 : index
      %c0_14 = arith.constant 0 : index
      %17 = vector.load %arg8[%c0_13, %c0_14] : memref<512x128xf32, #tpu.memory_space<vmem>>, vector<512x128xf32>
      tpu.vector_store %arg8[%c0_13, %c0_14], %16 {strides = array<i32>} : memref<512x128xf32, #tpu.memory_space<vmem>>, vector<512x128xf32>,
    } else {
    }
    %c0 = arith.constant 0 : index
    %c0_3 = arith.constant 0 : index
    %7 = vector.load %arg8[%c0, %c0_3] : memref<512x128xf32, #tpu.memory_space<vmem>>, vector<512x128xf32>
    %c0_4 = arith.constant 0 : index
    %c0_5 = arith.constant 0 : index
    %8 = vector.load %arg2[%c0_4, %c0_5] : memref<512x128xbf16, #tpu.memory_space<vmem>>, vector<512x128xbf16>
    %c0_6 = arith.constant 0 : index
    %c0_7 = arith.constant 0 : index
    %9 = vector.load %arg3[%c0_6, %c0_7] : memref<128x128xbf16, #tpu.memory_space<vmem>>, vector<128x128xbf16>
    %cst = arith.constant dense<0.000000e+00> : vector<512x128xf32>
    %10 = tpu.matmul %8, %9, %cst {dimension_numbers = #tpu.dot_dimension_numbers<[1], [0], [0], [1], [0, 0, 1, 1], [], []>} : vector<512x128xbf16>, vector<128x128xbf16>, vector<512x128xf32> -> vector<512x128xf32>
    %11 = arith.addf %7, %10 : vector<512x128xf32>
    %c0_8 = arith.constant 0 : index
    %c0_9 = arith.constant 0 : index
    %12 = vector.load %arg8[%c0_8, %c0_9] : memref<512x128xf32, #tpu.memory_space<vmem>>, vector<512x128xf32>
    tpu.vector_store %arg8[%c0_8, %c0_9], %11 {strides = array<i32>} : memref<512x128xf32, #tpu.memory_space<vmem>>, vector<512x128xf32>,
    %c0_i32_10 = arith.constant 0 : i32
    %13 = arith.cmpi eq, %arg1, %c0_i32_10 : i32
    %14 = arith.extui %13 : i1 to i32
    %c0_i32_11 = arith.constant 0 : i32
    %15 = arith.cmpi ne, %14, %c0_i32_11 : i32
    scf.if %15 {
      %c0_12 = arith.constant 0 : index
      %c0_13 = arith.constant 0 : index
      %16 = vector.load %arg8[%c0_12, %c0_13] : memref<512x128xf32, #tpu.memory_space<vmem>>, vector<512x128xf32>
      %17 = tpu.iota {dimensions = array<i32: 0>} : vector<512x128xi32>
      %18 = vector.broadcast %0 : i32 to vector<512x128xi32>
      %19 = arith.addi %17, %18 : vector<512x128xi32>
      %c512_i32_14 = arith.constant 512 : i32
      %20 = vector.broadcast %c512_i32_14 : i32 to vector<512x128xi32>
      %21 = arith.cmpi slt, %19, %20 : vector<512x128xi32>
      %cst_15 = arith.constant 0.000000e+00 : f32
      %22 = vector.broadcast %cst_15 : f32 to vector<512x128xf32>
      %23 = arith.select %21, %16, %22 : vector<512x128xi1>, vector<512x128xf32>
      %cst_16 = arith.constant dense<0.000000e+00> : vector<128xf32>
      %24 = vector.multi_reduction <add>, %23, %cst_16 [0] : vector<512x128xf32> to vector<128xf32>
      %25 = vector.shape_cast %24 : vector<128xf32> to vector<1x128xf32>
      %26 = vector.broadcast %3 : f32 to vector<1x128xf32>
      %27 = arith.divf %25, %26 : vector<1x128xf32>
      %28 = vector.broadcast %27 : vector<1x128xf32> to vector<512x128xf32>
      %29 = arith.subf %16, %28 : vector<512x128xf32>
      %cst_17 = arith.constant 0.000000e+00 : f32
      %30 = vector.broadcast %cst_17 : f32 to vector<512x128xf32>
      %31 = arith.select %21, %29, %30 : vector<512x128xi1>, vector<512x128xf32>
      %32 = arith.mulf %31, %31 : vector<512x128xf32>
      %cst_18 = arith.constant dense<0.000000e+00> : vector<128xf32>
      %33 = vector.multi_reduction <add>, %32, %cst_18 [0] : vector<512x128xf32> to vector<128xf32>
      %34 = vector.shape_cast %33 : vector<128xf32> to vector<1x128xf32>
      %35 = tpu.iota {dimensions = array<i32: 0>} : vector<8x128xi32>
      %c0_i32_19 = arith.constant 0 : i32
      %36 = vector.broadcast %c0_i32_19 : i32 to vector<8x128xi32>
      %37 = arith.cmpi eq, %35, %36 : vector<8x128xi32>
      %cst_20 = arith.constant 0.000000e+00 : f32
      %38 = vector.shape_cast %25 : vector<1x128xf32> to vector<1x128xf32>
      %39 = vector.broadcast %38 : vector<1x128xf32> to vector<8x128xf32>
      %40 = vector.broadcast %cst_20 : f32 to vector<8x128xf32>
      %41 = arith.select %37, %39, %40 : vector<8x128xi1>, vector<8x128xf32>
      %c1_i32 = arith.constant 1 : i32
      %42 = vector.broadcast %c1_i32 : i32 to vector<8x128xi32>
      %43 = arith.cmpi eq, %35, %42 : vector<8x128xi32>
      %cst_21 = arith.constant 0.000000e+00 : f32
      %44 = vector.shape_cast %34 : vector<1x128xf32> to vector<1x128xf32>
      %45 = vector.broadcast %44 : vector<1x128xf32> to vector<8x128xf32>
      %46 = vector.broadcast %cst_21 : f32 to vector<8x128xf32>
      %47 = arith.select %43, %45, %46 : vector<8x128xi1>, vector<8x128xf32>
      %48 = arith.addf %41, %47 : vector<8x128xf32>
      %c0_22 = arith.constant 0 : index
      %c0_23 = arith.constant 0 : index
      %49 = vector.load %arg7[%c0_22, %c0_23] : memref<8x128xf32, #tpu.memory_space<vmem>>, vector<8x128xf32>
      tpu.vector_store %arg7[%c0_22, %c0_23], %48 {strides = array<i32>} : memref<8x128xf32, #tpu.memory_space<vmem>>, vector<8x128xf32>,
      %50 = arith.truncf %16 : vector<512x128xf32> to vector<512x128xbf16>
      %c0_24 = arith.constant 0 : index
      %c0_25 = arith.constant 0 : index
      %51 = vector.load %arg6[%c0_24, %c0_25] : memref<512x128xbf16, #tpu.memory_space<vmem>>, vector<512x128xbf16>
      tpu.vector_store %arg6[%c0_24, %c0_25], %50 {strides = array<i32>} : memref<512x128xbf16, #tpu.memory_space<vmem>>, vector<512x128xbf16>,
    } else {
    }
    return
  }
  func.func @transform_0(%arg0: i32, %arg1: i32) -> (i32, i32) {
    %c0_i32 = arith.constant 0 : i32
    return %arg0, %arg1 : i32, i32
  }
  func.func @transform_1(%arg0: i32, %arg1: i32) -> (i32, i32) {
    %c0_i32 = arith.constant 0 : i32
    %c0_i32_0 = arith.constant 0 : i32
    return %arg1, %c0_i32 : i32, i32
  }
  func.func @transform_2(%arg0: i32, %arg1: i32) -> (i32, i32) {
    %c0_i32 = arith.constant 0 : i32
    %c0_i32_0 = arith.constant 0 : i32
    %c0_i32_1 = arith.constant 0 : i32
    return %c0_i32, %c0_i32_0 : i32, i32
  }
  func.func @transform_3(%arg0: i32, %arg1: i32) -> (i32, i32) {
    %c0_i32 = arith.constant 0 : i32
    %c0_i32_0 = arith.constant 0 : i32
    %c0_i32_1 = arith.constant 0 : i32
    return %c0_i32, %c0_i32_0 : i32, i32
  }
  func.func @transform_4(%arg0: i32, %arg1: i32) -> (i32, i32) {
    %c0_i32 = arith.constant 0 : i32
    %c0_i32_0 = arith.constant 0 : i32
    return %arg0, %c0_i32 : i32, i32
  }
  func.func @transform_5(%arg0: i32, %arg1: i32) -> (i32, i32) {
    %c0_i32 = arith.constant 0 : i32
    %c0_i32_0 = arith.constant 0 : i32
    return %arg0, %c0_i32 : i32, i32
  }
}

</mosaic_0001>

<bundles_post_ra>
// kernel: tpu_custom_call.1
= control target key start
LH: loop header
LB: loop body
LE: loop exit
PB: predicated region body
PF: predicated region fallthrough
CT: control target
= control target key end

     0   :  { %11 = vsyncpa [#allocation4], 0  ;;  %s3316_s0 = inlined_call_operand.hbm [shape: bf16[512,128], index: 0, kind: input, shape index: {}]   ;;  %s3317_s1 = inlined_call_operand.hbm [shape: bf16[128,128], index: 1, kind: input, shape index: {}]   ;;  %s3318_s2 = inlined_call_operand.vmem [shape: f32[1,128], index: 2, kind: input, shape index: {}]   ;;  %s3319_s3 = inlined_call_operand.vmem [shape: f32[1,128], index: 3, kind: input, shape index: {}]   ;;  %s3320_s4 = inlined_call_operand.hbm [shape: bf16[512,128], index: 4, kind: output, shape index: {0}]   ;;  %s3321_s5 = inlined_call_operand.hbm [shape: f32[8,128], index: 5, kind: output, shape index: {1}]  }
   0x1   :  { %12 = vsyncpa [#allocation7], 0 }
   0x2   :  { %13 = vsyncpa [#allocation5], 0 }
   0x3   :  { %14 = vsyncpa [#allocation10], 0  ;;  %s2577_s18 = smov [#allocation3]   ;;  %s2481_s2 = scalar_lea.hbm %s3316_s0, 4096 }
   0x4   :  { %s20_s19 = sshll.u32 %s2577_s18, 4  ;;  %p2482_p0 = scmp.ne.s32.totalorder %s3316_s0, %s2481_s2  ;;  %s21_s19 = int_to_ptr.vmem [resolvable:$true] %s20_s19 }
   0x5   :  { %p2485_p1 = scmp.lt.u32.totalorder %s2481_s2, %s3316_s0 }
   0x7   :  { %p2487_p2 = pnand %p2485_p1, %p2482_p0 }
   0x9   :  { %2490 = shalt.err (!%p2487_p2)
}
   0xa   :  { %s2491_s25 = scalar_lea.vmem %s21_s19, 4096  ;;  %p2496_p4 = scmp.lt.s32.totalorder %s21_s19, %s21_s19 }
   0xb   :  { %p2492_p3 = scmp.ne.s32.totalorder %s21_s19, %s2491_s25  ;;  %p2497_p5 = scmp.lt.s32.totalorder %s2491_s25, %s2491_s25 }
   0xd   :  { %p2498_p6 = por %p2497_p5, %p2496_p4 }
   0xf   :  { %p2499_p7 = pnand %p2498_p6, %p2492_p3 }
  0x11   :  { %2502 = shalt.err (!%p2499_p7)
}
  0x12   :  { %s2578_s26 = smov 64   ;;  %s2579_s27 = smov 4  }
  0x13   :  { %26 = dma.hbm_to_vmem [thread:$0]  %s3316_s0, 4096, %s21_s19, [#allocation4], %s2578_s26, %s2578_s26, %s2579_s27  }
  0x14   :  { %s2580_s30 = smov [#allocation6]   ;;  %s2503_s9 = scalar_lea.hbm %s3317_s1, 1024 }
  0x15   :  { %s32_s6 = sshll.u32 %s2580_s30, 4  ;;  %p2504_p8 = scmp.ne.s32.totalorder %s3317_s1, %s2503_s9  ;;  %s33_s6 = int_to_ptr.vmem [resolvable:$true] %s32_s6 }
  0x16   :  { %p2507_p9 = scmp.lt.u32.totalorder %s2503_s9, %s3317_s1 }
  0x18   :  { %p2509_p10 = pnand %p2507_p9, %p2504_p8 }
  0x1a   :  { %2512 = shalt.err (!%p2509_p10)
}
  0x1b   :  { %s2513_s14 = scalar_lea.vmem %s33_s6, 1024  ;;  %p2518_p12 = scmp.lt.s32.totalorder %s33_s6, %s33_s6 }
  0x1c   :  { %p2514_p11 = scmp.ne.s32.totalorder %s33_s6, %s2513_s14  ;;  %p2519_p13 = scmp.lt.s32.totalorder %s2513_s14, %s2513_s14 }
  0x1e   :  { %p2520_p0 = por %p2519_p13, %p2518_p12 }
  0x20   :  { %p2521_p1 = pnand %p2520_p0, %p2514_p11 }
  0x22   :  { %2524 = shalt.err (!%p2521_p1)
}
  0x23   :  { %38 = dma.hbm_to_vmem [thread:$0]  %s3317_s1, 1024, %s33_s6, [#allocation7], %s2578_s26, %s2578_s26, %s2579_s27  }
  0x24   :  { %2569 = dma.done.wait [#allocation4], 4096  }
  0x25   :  { %2570 = vsyncadd [#allocation4], 4294963200 }
  0x26   :  { %2571 = dma.done.wait [#allocation7], 1024  }
  0x27   :  { %2572 = vsyncadd [#allocation7], 4294966272  ;;  %v2441_v0 = vld [vmem:[#allocation6] sm:$0xff]   ;;  %v2442_v1 = vld [vmem:[#allocation6 + $0x8] sm:$0xff]   ;;  %s2581_s1 = smov [#allocation8]  }
  0x28   :  { %2339 = vmatprep.subr.bf16.mxu0 %v2441_v0  ;;  %2419 = vmatprep.subr.bf16.mxu1 %v2441_v0  ;;  %v2443_v2 = vld [vmem:[#allocation6 + $0x10] sm:$0xff]   ;;  %v2444_v3 = vld [vmem:[#allocation6 + $0x18] sm:$0xff]   ;;  %v2449_v4 = vld [vmem:[#allocation3] sm:$0xff]   ;;  %s1913_s16 = sshll.u32 %s2581_s1, 4  ;;  %s1914_s16 = int_to_ptr.vmem [resolvable:$true] %s1913_s16 }
  0x29   :  { %2340 = vmatpush3.bf16.msra.mxu0 %v2441_v0  ;;  %2427 = vmatpush3.bf16.msra.mxu1 %v2441_v0  ;;  %v2445_v5 = vld [vmem:[#allocation6 + $0x20] sm:$0xff]   ;;  %v2446_v6 = vld [vmem:[#allocation6 + $0x28] sm:$0xff]   ;;  %v2447_v7 = vld [vmem:[#allocation6 + $0x30] sm:$0xff]   ;;  %s2525_s17 = scalar_lea.vmem %s1914_s16, 4096  ;;  %p2530_p3 = scmp.lt.s32.totalorder %s1914_s16, %s1914_s16 }
  0x2a   :  { %2341 = vmatprep.subr.bf16.mxu0 %v2442_v1  ;;  %2420 = vmatprep.subr.bf16.mxu1 %v2442_v1  ;;  %v2448_v8 = vld [vmem:[#allocation6 + $0x38] sm:$0xff]   ;;  %v2465_v9 = vld [vmem:[#allocation3 + $0x80] sm:$0xff]   ;;  %v2450_v10 = vld [vmem:[#allocation3 + $0x8] sm:$0xff]   ;;  %p2526_p2 = scmp.ne.s32.totalorder %s1914_s16, %s2525_s17  ;;  %p2531_p4 = scmp.lt.s32.totalorder %s2525_s17, %s2525_s17 }
  0x2b   :  { %2355 = vmatprep.mubr.bf16.mxu0 %v2449_v4  ;;  %2387 = vmatprep.mubr.bf16.mxu1 %v2465_v9  ;;  %v2451_v11 = vld [vmem:[#allocation3 + $0x10] sm:$0xff]   ;;  %v2466_v12 = vld [vmem:[#allocation3 + $0x88] sm:$0xff]   ;;  %v2452_v14 = vld [vmem:[#allocation3 + $0x18] sm:$0xff]  }
  0x2c   :  { %v2467_v13 = vld [vmem:[#allocation3 + $0x90] sm:$0xff]   ;;  %v2453_v15 = vld [vmem:[#allocation3 + $0x20] sm:$0xff]   ;;  %v2468_v16 = vld [vmem:[#allocation3 + $0x98] sm:$0xff]   ;;  %p2532_p5 = por %p2531_p4, %p2530_p3 }
  0x2d   :  { %2342 = vmatpush3.bf16.msra.mxu0 %v2442_v1  ;;  %2428 = vmatpush3.bf16.msra.mxu1 %v2442_v1  ;;  %v2469_v17 = vld [vmem:[#allocation3 + $0xa0] sm:$0xff]   ;;  %v2454_v18 = vld [vmem:[#allocation3 + $0x28] sm:$0xff]   ;;  %v2455_v20 = vld [vmem:[#allocation3 + $0x30] sm:$0xff]  }
  0x2e   :  { %2343 = vmatprep.subr.bf16.mxu0 %v2443_v2  ;;  %2421 = vmatprep.subr.bf16.mxu1 %v2443_v2  ;;  %v2470_v19 = vld [vmem:[#allocation3 + $0xa8] sm:$0xff]   ;;  %v2471_v21 = vld [vmem:[#allocation3 + $0xb0] sm:$0xff]   ;;  %v2456_v22 = vld [vmem:[#allocation3 + $0x38] sm:$0xff]   ;;  %p2533_p6 = pnand %p2532_p5, %p2526_p2 }
  0x2f   :  { %v2472_v23 = vld [vmem:[#allocation3 + $0xb8] sm:$0xff]   ;;  %v2457_v24 = vld [vmem:[#allocation3 + $0x40] sm:$0xff]   ;;  %v2458_v26 = vld [vmem:[#allocation3 + $0x48] sm:$0xff]  }
  0x30   :  { %v2473_v25 = vld [vmem:[#allocation3 + $0xc0] sm:$0xff]   ;;  %v2474_v27 = vld [vmem:[#allocation3 + $0xc8] sm:$0xff]   ;;  %v2459_v28 = vld [vmem:[#allocation3 + $0x50] sm:$0xff]  }
  0x31   :  { %2344 = vmatpush3.bf16.msra.mxu0 %v2443_v2  ;;  %2429 = vmatpush3.bf16.msra.mxu1 %v2443_v2  ;;  %v2475_v29 = vld [vmem:[#allocation3 + $0xd0] sm:$0xff]   ;;  %v2460_v30 = vld [vmem:[#allocation3 + $0x58] sm:$0xff]   ;;  %v2461_v32 = vld [vmem:[#allocation3 + $0x60] sm:$0xff]  }
  0x32   :  { %2345 = vmatprep.subr.bf16.mxu0 %v2444_v3  ;;  %2422 = vmatprep.subr.bf16.mxu1 %v2444_v3  ;;  %v2476_v31 = vld [vmem:[#allocation3 + $0xd8] sm:$0xff]   ;;  %v2477_v33 = vld [vmem:[#allocation3 + $0xe0] sm:$0xff]   ;;  %v2462_v34 = vld [vmem:[#allocation3 + $0x68] sm:$0xff]  }
  0x33   :  { %v2478_v35 = vld [vmem:[#allocation3 + $0xe8] sm:$0xff]   ;;  %v2463_v36 = vld [vmem:[#allocation3 + $0x70] sm:$0xff]   ;;  %v2464_v38 = vld [vmem:[#allocation3 + $0x78] sm:$0xff]  }
  0x34   :  { %v2479_v37 = vld [vmem:[#allocation3 + $0xf0] sm:$0xff]   ;;  %v2480_v39 = vld [vmem:[#allocation3 + $0xf8] sm:$0xff]  }
  0x35   :  { %2346 = vmatpush3.bf16.msra.mxu0 %v2444_v3  ;;  %2430 = vmatpush3.bf16.msra.mxu1 %v2444_v3 }
  0x36   :  { %2347 = vmatprep.subr.bf16.mxu0 %v2445_v5  ;;  %2423 = vmatprep.subr.bf16.mxu1 %v2445_v5 }
  0x39   :  { %2348 = vmatpush3.bf16.msra.mxu0 %v2445_v5  ;;  %2431 = vmatpush3.bf16.msra.mxu1 %v2445_v5 }
  0x3a   :  { %2349 = vmatprep.subr.bf16.mxu0 %v2446_v6  ;;  %2424 = vmatprep.subr.bf16.mxu1 %v2446_v6 }
  0x3d   :  { %2350 = vmatpush3.bf16.msra.mxu0 %v2446_v6  ;;  %2432 = vmatpush3.bf16.msra.mxu1 %v2446_v6 }
  0x3e   :  { %2351 = vmatprep.subr.bf16.mxu0 %v2447_v7  ;;  %2425 = vmatprep.subr.bf16.mxu1 %v2447_v7 }
  0x41   :  { %2352 = vmatpush3.bf16.msra.mxu0 %v2447_v7  ;;  %2433 = vmatpush3.bf16.msra.mxu1 %v2447_v7 }
  0x42   :  { %2353 = vmatprep.subr.bf16.mxu0 %v2448_v8  ;;  %2426 = vmatprep.subr.bf16.mxu1 %v2448_v8 }
  0x45   :  { %2354 = vmatpush3.bf16.msra.mxu0 %v2448_v8  ;;  %2434 = vmatpush3.bf16.msra.mxu1 %v2448_v8 }
  0x48   :  { %2356 = vmatmul.mubr.bf16.vlgmr.msra.gmra.mrb[0].mxu0 %v2450_v10  ;;  %2388 = vmatmul.mubr.bf16.vlgmr.msra.gmra.mrb[0].mxu1 %v2466_v12 }
  0x49   :  { %2359 = vmatprep.mubr.bf16.mxu0 %v2451_v11  ;;  %2391 = vmatprep.mubr.bf16.mxu1 %v2467_v13 }
  0x50   :  { %2360 = vmatmul.mubr.bf16.gmra.mrb[4].mxu0 %v2452_v14  ;;  %2392 = vmatmul.mubr.bf16.gmra.mrb[4].mxu1 %v2468_v16 }
  0x51   :  { %2363 = vmatprep.mubr.bf16.mxu0 %v2453_v15  ;;  %2395 = vmatprep.mubr.bf16.mxu1 %v2469_v17 }
  0x58   :  { %2364 = vmatmul.mubr.bf16.gmra.mrb[8].mxu0 %v2454_v18  ;;  %2396 = vmatmul.mubr.bf16.gmra.mrb[8].mxu1 %v2470_v19 }
  0x59   :  { %2367 = vmatprep.mubr.bf16.mxu0 %v2455_v20  ;;  %2399 = vmatprep.mubr.bf16.mxu1 %v2471_v21 }
  0x60   :  { %2368 = vmatmul.mubr.bf16.gmra.mrb[12].mxu0 %v2456_v22  ;;  %2400 = vmatmul.mubr.bf16.gmra.mrb[12].mxu1 %v2472_v23 }
  0x61   :  { %2371 = vmatprep.mubr.bf16.mxu0 %v2457_v24  ;;  %2403 = vmatprep.mubr.bf16.mxu1 %v2473_v25 }
  0x68   :  { %2372 = vmatmul.mubr.bf16.gmra.mrb[16].mxu0 %v2458_v26  ;;  %2404 = vmatmul.mubr.bf16.gmra.mrb[16].mxu1 %v2474_v27 }
  0x69   :  { %2375 = vmatprep.mubr.bf16.mxu0 %v2459_v28  ;;  %2407 = vmatprep.mubr.bf16.mxu1 %v2475_v29 }
  0x70   :  { %2376 = vmatmul.mubr.bf16.gmra.mrb[20].mxu0 %v2460_v30  ;;  %2408 = vmatmul.mubr.bf16.gmra.mrb[20].mxu1 %v2476_v31 }
  0x71   :  { %2379 = vmatprep.mubr.bf16.mxu0 %v2461_v32  ;;  %2411 = vmatprep.mubr.bf16.mxu1 %v2477_v33 }
  0x78   :  { %2380 = vmatmul.mubr.bf16.gmra.mrb[24].mxu0 %v2462_v34  ;;  %2412 = vmatmul.mubr.bf16.gmra.mrb[24].mxu1 %v2478_v35 }
  0x79   :  { %2383 = vmatprep.mubr.bf16.mxu0 %v2463_v36  ;;  %2415 = vmatprep.mubr.bf16.mxu1 %v2479_v37 }
  0x80   :  { %2384 = vmatmul.mubr.bf16.gmra.mrb[28].mxu0 %v2464_v38  ;;  %2416 = vmatmul.mubr.bf16.gmra.mrb[28].mxu1 %v2480_v39 }
 0x11b   :  { %v2643_v40 = vpop.f32.mrb[0].mxu0  ;;  %v2645_v41 = vpop.f32.mrb[0].mxu1 }
 0x11c   :  { %v2647_v42 = vpop.f32.mrb[1].mxu0  ;;  %v2649_v43 = vpop.f32.mrb[1].mxu1 }
 0x11d   :  { %v2651_v44 = vpop.f32.mrb[2].mxu0  ;;  %v2653_v45 = vpop.f32.mrb[2].mxu1 }
 0x11e   :  { %v2116_v46 = vpack.c.bf16 %v2651_v44, %v2643_v40  ;;  %v2657_v47 = vpop.f32.mrb[3].mxu0  ;;  %v2196_v48 = vpack.c.bf16 %v2653_v45, %v2645_v41  ;;  %v2661_v49 = vpop.f32.mrb[3].mxu1 }
 0x11f   :  { %v1249_v50 = vadd.f32 %v2657_v47, %v2647_v42  ;;  %v2111_v51 = vpack.c.bf16 %v2657_v47, %v2647_v42  ;;  %v2191_v52 = vpack.c.bf16 %v2661_v49, %v2649_v43 }
 0x120   :  { %2268 = vst [vmem:[#allocation8 + $0x8] sm:$0xff] %v2116_v46   ;;  %2284 = vst [vmem:[#allocation8 + $0x88] sm:$0xff] %v2196_v48  }
 0x121   :  { %v1250_v53 = vadd.f32 %v2643_v40, %v1249_v50  ;;  %2112 = vst [vmem:[#allocation8] sm:$0xff] %v2111_v51   ;;  %2283 = vst [vmem:[#allocation8 + $0x80] sm:$0xff] %v2191_v52  }
 0x123   :  { %v2670_v54 = vpop.f32.mrb[4].mxu0  ;;  %v1251_v55 = vadd.f32 %v2651_v44, %v1250_v53  ;;  %v2673_v56 = vpop.f32.mrb[4].mxu1 }
 0x124   :  { %v2675_v57 = vpop.f32.mrb[5].mxu0  ;;  %v2677_v58 = vpop.f32.mrb[5].mxu1 }
 0x125   :  { %v1252_v59 = vadd.f32 %v1251_v55, %v2675_v57  ;;  %v2680_v60 = vpop.f32.mrb[6].mxu0  ;;  %v2682_v61 = vpop.f32.mrb[6].mxu1 }
 0x126   :  { %v2126_v62 = vpack.c.bf16 %v2680_v60, %v2670_v54  ;;  %v2686_v63 = vpop.f32.mrb[7].mxu0  ;;  %v2206_v0 = vpack.c.bf16 %v2682_v61, %v2673_v56  ;;  %v2690_v1 = vpop.f32.mrb[7].mxu1 }
 0x127   :  { %v1253_v2 = vadd.f32 %v1252_v59, %v2686_v63  ;;  %v2121_v3 = vpack.c.bf16 %v2686_v63, %v2675_v57  ;;  %v2201_v4 = vpack.c.bf16 %v2690_v1, %v2677_v58 }
 0x128   :  { %2270 = vst [vmem:[#allocation8 + $0x18] sm:$0xff] %v2126_v62   ;;  %2286 = vst [vmem:[#allocation8 + $0x98] sm:$0xff] %v2206_v0  }
 0x129   :  { %v1254_v5 = vadd.f32 %v2670_v54, %v1253_v2  ;;  %2269 = vst [vmem:[#allocation8 + $0x10] sm:$0xff] %v2121_v3   ;;  %2285 = vst [vmem:[#allocation8 + $0x90] sm:$0xff] %v2201_v4  }
 0x12b   :  { %v2698_v6 = vpop.f32.mrb[8].mxu0  ;;  %v1255_v7 = vadd.f32 %v2680_v60, %v1254_v5  ;;  %v2701_v8 = vpop.f32.mrb[8].mxu1 }
 0x12c   :  { %v2703_v9 = vpop.f32.mrb[9].mxu0  ;;  %v2705_v10 = vpop.f32.mrb[9].mxu1 }
 0x12d   :  { %v1256_v11 = vadd.f32 %v1255_v7, %v2703_v9  ;;  %v2708_v12 = vpop.f32.mrb[10].mxu0  ;;  %v2710_v13 = vpop.f32.mrb[10].mxu1 }
 0x12e   :  { %v2136_v14 = vpack.c.bf16 %v2708_v12, %v2698_v6  ;;  %v2714_v15 = vpop.f32.mrb[11].mxu0  ;;  %v2216_v16 = vpack.c.bf16 %v2710_v13, %v2701_v8  ;;  %v2718_v17 = vpop.f32.mrb[11].mxu1 }
 0x12f   :  { %v1257_v18 = vadd.f32 %v1256_v11, %v2714_v15  ;;  %v2131_v19 = vpack.c.bf16 %v2714_v15, %v2703_v9  ;;  %v2211_v20 = vpack.c.bf16 %v2718_v17, %v2705_v10 }
 0x130   :  { %2272 = vst [vmem:[#allocation8 + $0x28] sm:$0xff] %v2136_v14   ;;  %2288 = vst [vmem:[#allocation8 + $0xa8] sm:$0xff] %v2216_v16  }
 0x131   :  { %v1258_v21 = vadd.f32 %v2698_v6, %v1257_v18  ;;  %2271 = vst [vmem:[#allocation8 + $0x20] sm:$0xff] %v2131_v19   ;;  %2287 = vst [vmem:[#allocation8 + $0xa0] sm:$0xff] %v2211_v20  }
 0x133   :  { %v2726_v22 = vpop.f32.mrb[12].mxu0  ;;  %v1259_v23 = vadd.f32 %v2708_v12, %v1258_v21  ;;  %v2729_v24 = vpop.f32.mrb[12].mxu1 }
 0x134   :  { %v2731_v25 = vpop.f32.mrb[13].mxu0  ;;  %v2733_v26 = vpop.f32.mrb[13].mxu1 }
 0x135   :  { %v1260_v27 = vadd.f32 %v1259_v23, %v2731_v25  ;;  %v2736_v28 = vpop.f32.mrb[14].mxu0  ;;  %v2738_v29 = vpop.f32.mrb[14].mxu1 }
 0x136   :  { %v2146_v30 = vpack.c.bf16 %v2736_v28, %v2726_v22  ;;  %v2742_v31 = vpop.f32.mrb[15].mxu0  ;;  %v2226_v32 = vpack.c.bf16 %v2738_v29, %v2729_v24  ;;  %v2746_v33 = vpop.f32.mrb[15].mxu1 }
 0x137   :  { %v1261_v34 = vadd.f32 %v1260_v27, %v2742_v31  ;;  %v2141_v35 = vpack.c.bf16 %v2742_v31, %v2731_v25  ;;  %v2221_v36 = vpack.c.bf16 %v2746_v33, %v2733_v26 }
 0x138   :  { %2274 = vst [vmem:[#allocation8 + $0x38] sm:$0xff] %v2146_v30   ;;  %2290 = vst [vmem:[#allocation8 + $0xb8] sm:$0xff] %v2226_v32  }
 0x139   :  { %v1262_v37 = vadd.f32 %v2726_v22, %v1261_v34  ;;  %2273 = vst [vmem:[#allocation8 + $0x30] sm:$0xff] %v2141_v35   ;;  %2289 = vst [vmem:[#allocation8 + $0xb0] sm:$0xff] %v2221_v36  }
 0x13b   :  { %v2754_v38 = vpop.f32.mrb[16].mxu0  ;;  %v1263_v39 = vadd.f32 %v2736_v28, %v1262_v37  ;;  %v2757_v46 = vpop.f32.mrb[16].mxu1 }
 0x13c   :  { %3337 = vst [vmem:[#allocation15_spill] sm:$0xff] %v2754_v38  ;;  %v2759_v48 = vpop.f32.mrb[17].mxu0  ;;  %v2761_v50 = vpop.f32.mrb[17].mxu1 }
 0x13d   :  { %v1264_v51 = vadd.f32 %v1263_v39, %v2759_v48  ;;  %v2764_v52 = vpop.f32.mrb[18].mxu0  ;;  %v2766_v53 = vpop.f32.mrb[18].mxu1 }
 0x13e   :  { %3338 = vst [vmem:[#allocation16_spill] sm:$0xff] %v2764_v52  ;;  %v2156_v55 = vpack.c.bf16 %v2764_v52, %v2754_v38  ;;  %v2770_v59 = vpop.f32.mrb[19].mxu0  ;;  %v2236_v62 = vpack.c.bf16 %v2766_v53, %v2757_v46  ;;  %v2774_v0 = vpop.f32.mrb[19].mxu1 }
 0x13f   :  { %3339 = vst [vmem:[#allocation17_spill] sm:$0xff] %v2770_v59  ;;  %v1265_v2 = vadd.f32 %v1264_v51, %v2770_v59  ;;  %v2151_v3 = vpack.c.bf16 %v2770_v59, %v2759_v48  ;;  %v2231_v4 = vpack.c.bf16 %v2774_v0, %v2761_v50 }
 0x140   :  { %2276 = vst [vmem:[#allocation8 + $0x48] sm:$0xff] %v2156_v55   ;;  %2292 = vst [vmem:[#allocation8 + $0xc8] sm:$0xff] %v2236_v62  }
 0x141   :  { %v1266_v5 = vadd.f32 %v2754_v38, %v1265_v2  ;;  %2275 = vst [vmem:[#allocation8 + $0x40] sm:$0xff] %v2151_v3   ;;  %2291 = vst [vmem:[#allocation8 + $0xc0] sm:$0xff] %v2231_v4  }
 0x143   :  { %v2782_v7 = vpop.f32.mrb[20].mxu0  ;;  %v1267_v11 = vadd.f32 %v2764_v52, %v1266_v5  ;;  %v2785_v14 = vpop.f32.mrb[20].mxu1 }
 0x144   :  { %3340 = vst [vmem:[#allocation18_spill] sm:$0xff] %v2782_v7  ;;  %v2787_v16 = vpop.f32.mrb[21].mxu0  ;;  %v2789_v18 = vpop.f32.mrb[21].mxu1 }
 0x145   :  { %3341 = vst [vmem:[#allocation19_spill] sm:$0xff] %v2787_v16  ;;  %v1268_v19 = vadd.f32 %v1267_v11, %v2787_v16  ;;  %v2792_v20 = vpop.f32.mrb[22].mxu0  ;;  %v2794_v21 = vpop.f32.mrb[22].mxu1 }
 0x146   :  { %3342 = vst [vmem:[#allocation20_spill] sm:$0xff] %v2792_v20  ;;  %3343 = vst [vmem:[#allocation21_spill] sm:$0xff] %v2794_v21  ;;  %v2166_v23 = vpack.c.bf16 %v2792_v20, %v2782_v7  ;;  %v2798_v27 = vpop.f32.mrb[23].mxu0  ;;  %v2246_v30 = vpack.c.bf16 %v2794_v21, %v2785_v14  ;;  %v2802_v32 = vpop.f32.mrb[23].mxu1 }
 0x147   :  { %3344 = vst [vmem:[#allocation22_spill] sm:$0xff] %v2798_v27  ;;  %v1269_v34 = vadd.f32 %v1268_v19, %v2798_v27  ;;  %v2161_v35 = vpack.c.bf16 %v2798_v27, %v2787_v16  ;;  %v2241_v36 = vpack.c.bf16 %v2802_v32, %v2789_v18 }
 0x148   :  { %2278 = vst [vmem:[#allocation8 + $0x58] sm:$0xff] %v2166_v23   ;;  %2294 = vst [vmem:[#allocation8 + $0xd8] sm:$0xff] %v2246_v30  }
 0x149   :  { %v1270_v37 = vadd.f32 %v2782_v7, %v1269_v34  ;;  %2277 = vst [vmem:[#allocation8 + $0x50] sm:$0xff] %v2161_v35   ;;  %2293 = vst [vmem:[#allocation8 + $0xd0] sm:$0xff] %v2241_v36  }
 0x14b   :  { %v2810_v39 = vpop.f32.mrb[24].mxu0  ;;  %v1271_v51 = vadd.f32 %v2792_v20, %v1270_v37  ;;  %v2813_v55 = vpop.f32.mrb[24].mxu1 }
 0x14c   :  { %3345 = vst [vmem:[#allocation23_spill] sm:$0xff] %v2810_v39  ;;  %v2815_v62 = vpop.f32.mrb[25].mxu0  ;;  %v2817_v2 = vpop.f32.mrb[25].mxu1 }
 0x14d   :  { %3346 = vst [vmem:[#allocation24_spill] sm:$0xff] %v2815_v62  ;;  %v1272_v3 = vadd.f32 %v1271_v51, %v2815_v62  ;;  %v2820_v4 = vpop.f32.mrb[26].mxu0  ;;  %v2822_v5 = vpop.f32.mrb[26].mxu1 }
 0x14e   :  { %3347 = vst [vmem:[#allocation25_spill] sm:$0xff] %v2820_v4  ;;  %v2176_v11 = vpack.c.bf16 %v2820_v4, %v2810_v39  ;;  %v2826_v19 = vpop.f32.mrb[27].mxu0  ;;  %v2256_v23 = vpack.c.bf16 %v2822_v5, %v2813_v55  ;;  %v2830_v30 = vpop.f32.mrb[27].mxu1 }
 0x14f   :  { %3348 = vst [vmem:[#allocation26_spill] sm:$0xff] %v2826_v19  ;;  %v1273_v34 = vadd.f32 %v1272_v3, %v2826_v19  ;;  %v2171_v35 = vpack.c.bf16 %v2826_v19, %v2815_v62  ;;  %v2251_v36 = vpack.c.bf16 %v2830_v30, %v2817_v2 }
 0x150   :  { %2280 = vst [vmem:[#allocation8 + $0x68] sm:$0xff] %v2176_v11   ;;  %2296 = vst [vmem:[#allocation8 + $0xe8] sm:$0xff] %v2256_v23  }
 0x151   :  { %v1274_v37 = vadd.f32 %v2810_v39, %v1273_v34  ;;  %2279 = vst [vmem:[#allocation8 + $0x60] sm:$0xff] %v2171_v35   ;;  %2295 = vst [vmem:[#allocation8 + $0xe0] sm:$0xff] %v2251_v36  }
 0x153   :  { %v2838_v51 = vpop.f32.mrb[28].mxu0  ;;  %v1275_v20 = vadd.f32 %v2820_v4, %v1274_v37  ;;  %v2841_v7 = vpop.f32.mrb[28].mxu1 }
 0x154   :  { %v2843_v27 = vpop.f32.mrb[29].mxu0  ;;  %v2845_v3 = vpop.f32.mrb[29].mxu1 }
 0x155   :  { %3349 = vst [vmem:[#allocation27_spill] sm:$0xff] %v2843_v27  ;;  %v1276_v19 = vadd.f32 %v1275_v20, %v2843_v27  ;;  %v2848_v62 = vpop.f32.mrb[30].mxu0  ;;  %v2850_v11 = vpop.f32.mrb[30].mxu1 }
 0x156   :  { %v2186_v23 = vpack.c.bf16 %v2848_v62, %v2838_v51  ;;  %v2854_v34 = vpop.f32.mrb[31].mxu0  ;;  %v2266_v35 = vpack.c.bf16 %v2850_v11, %v2841_v7  ;;  %v2858_v36 = vpop.f32.mrb[31].mxu1 }
 0x157   :  { %3350 = vst [vmem:[#allocation28_spill] sm:$0xff] %v2854_v34  ;;  %v1277_v37 = vadd.f32 %v1276_v19, %v2854_v34  ;;  %v2181_v4 = vpack.c.bf16 %v2854_v34, %v2843_v27  ;;  %v2261_v20 = vpack.c.bf16 %v2858_v36, %v2845_v3 }
 0x158   :  { %2282 = vst [vmem:[#allocation8 + $0x78] sm:$0xff] %v2186_v23   ;;  %2298 = vst [vmem:[#allocation8 + $0xf8] sm:$0xff] %v2266_v35  }
 0x159   :  { %v1278_v39 = vadd.f32 %v2838_v51, %v1277_v37  ;;  %2281 = vst [vmem:[#allocation8 + $0x70] sm:$0xff] %v2181_v4   ;;  %2297 = vst [vmem:[#allocation8 + $0xf0] sm:$0xff] %v2261_v20  }
 0x15b   :  { %v1279_v16 = vadd.f32 %v2848_v62, %v1278_v39 }
 0x15d   :  { %v1280_v52 = vadd.f32 %v1279_v16, %v2649_v43 }
 0x15f   :  { %v1281_v38 = vadd.f32 %v1280_v52, %v2661_v49 }
 0x161   :  { %v1282_v19 = vadd.f32 %v2645_v41, %v1281_v38 }
 0x163   :  { %v1283_v59 = vadd.f32 %v2653_v45, %v1282_v19 }
 0x165   :  { %v1284_v34 = vadd.f32 %v1283_v59, %v2677_v58 }
 0x167   :  { %v1285_v27 = vadd.f32 %v1284_v34, %v2690_v1 }
 0x169   :  { %v1286_v23 = vadd.f32 %v2673_v56, %v1285_v27 }
 0x16b   :  { %v1287_v35 = vadd.f32 %v2682_v61, %v1286_v23 }
 0x16d   :  { %v1288_v4 = vadd.f32 %v1287_v35, %v2705_v10 }
 0x16f   :  { %v1289_v39 = vadd.f32 %v1288_v4, %v2718_v17 }
 0x171   :  { %v1290_v16 = vadd.f32 %v2701_v8, %v1289_v39 }
 0x173   :  { %v1291_v52 = vadd.f32 %v2710_v13, %v1290_v16 }
 0x175   :  { %v1292_v38 = vadd.f32 %v1291_v52, %v2733_v26 }
 0x177   :  { %v1293_v37 = vadd.f32 %v1292_v38, %v2746_v33 }
 0x179   :  { %v1294_v59 = vadd.f32 %v2729_v24, %v1293_v37 }
 0x17b   :  { %v1295_v34 = vadd.f32 %v2738_v29, %v1294_v59 }
 0x17d   :  { %v1296_v27 = vadd.f32 %v1295_v34, %v2761_v50 }
 0x17f   :  { %v1297_v20 = vadd.f32 %v1296_v27, %v2774_v0 }
 0x181   :  { %v1298_v19 = vadd.f32 %v2757_v46, %v1297_v20 }
 0x183   :  { %v1299_v23 = vadd.f32 %v2766_v53, %v1298_v19 }
 0x185   :  { %v1300_v35 = vadd.f32 %v1299_v23, %v2789_v18 }
 0x187   :  { %v1301_v4 = vadd.f32 %v1300_v35, %v2802_v32 }
 0x189   :  { %v1302_v39 = vadd.f32 %v2785_v14, %v1301_v4 }
 0x18b   :  { %v1303_v16 = vadd.f32 %v2794_v21, %v1302_v39 }
 0x18d   :  { %v1304_v52 = vadd.f32 %v1303_v16, %v2817_v2 }
 0x18f   :  { %v1305_v38 = vadd.f32 %v1304_v52, %v2830_v30 }
 0x191   :  { %v1306_v37 = vadd.f32 %v2813_v55, %v1305_v38 }
 0x193   :  { %v1307_v59 = vadd.f32 %v2822_v5, %v1306_v37 }
 0x195   :  { %v1308_v34 = vadd.f32 %v1307_v59, %v2845_v3 }
 0x197   :  { %v1309_v27 = vadd.f32 %v1308_v34, %v2858_v36 }
 0x199   :  { %v1310_v20 = vadd.f32 %v2841_v7, %v1309_v27  ;;  %v3352_v27 = vld [vmem:[#allocation17_spill] sm:$0xff] }
 0x19b   :  { %v1311_v19 = vadd.f32 %v2850_v11, %v1310_v20  ;;  %v3353_v20 = vld [vmem:[#allocation15_spill] sm:$0xff] }
 0x19d   :  { %v1312_v23 = vrot.slane %v1311_v19, 4 }
 0x19f   :  { %v1313_v35 = vadd.f32 %v1312_v23, %v1311_v19  ;;  %v3354_v19 = vld [vmem:[#allocation16_spill] sm:$0xff]  ;;  %v3356_v23 = vld [vmem:[#allocation19_spill] sm:$0xff] }
 0x1a1   :  { %v1314_v4 = vrot.slane %v1313_v35, 2 }
 0x1a3   :  { %v1315_v39 = vadd.f32 %v1314_v4, %v1313_v35  ;;  %v3358_v35 = vld [vmem:[#allocation22_spill] sm:$0xff] }
 0x1a4   :  { %v3360_v4 = vld [vmem:[#allocation18_spill] sm:$0xff] }
 0x1a5   :  { %v1316_v21 = vrot.slane %v1315_v39, 1 }
 0x1a7   :  { %v2899_v16 = vadd.f32 %v1316_v21, %v1315_v39 }
 0x1a9   :  { %3351 = vst [vmem:[#allocation29_spill] sm:$0xff] %v2899_v16  ;;  %v2902_v52 = vmul.f32 0.001953125, %v2899_v16  ;;  %v3364_v16 = vld [vmem:[#allocation24_spill] sm:$0xff] }
 0x1ab   :  { %v2906_v38 = vsub.f32 %v2647_v42, %v2902_v52  ;;  %v2910_v37 = vsub.f32 %v2657_v47, %v2902_v52  ;;  %v2914_v59 = vsub.f32 %v2643_v40, %v2902_v52  ;;  %v2918_v34 = vsub.f32 %v2651_v44, %v2902_v52 }
 0x1ac   :  { %v2922_v21 = vsub.f32 %v2675_v57, %v2902_v52  ;;  %v2926_v42 = vsub.f32 %v2686_v63, %v2902_v52  ;;  %v2930_v47 = vsub.f32 %v2670_v54, %v2902_v52  ;;  %v2934_v40 = vsub.f32 %v2680_v60, %v2902_v52 }
 0x1ad   :  { %v2938_v44 = vsub.f32 %v2703_v9, %v2902_v52  ;;  %v2942_v57 = vsub.f32 %v2714_v15, %v2902_v52  ;;  %v2946_v63 = vsub.f32 %v2698_v6, %v2902_v52  ;;  %v2950_v54 = vsub.f32 %v2708_v12, %v2902_v52 }
 0x1ae   :  { %v2954_v60 = vsub.f32 %v2731_v25, %v2902_v52  ;;  %v2958_v9 = vsub.f32 %v2742_v31, %v2902_v52  ;;  %v2962_v15 = vsub.f32 %v2726_v22, %v2902_v52  ;;  %v2966_v6 = vsub.f32 %v2736_v28, %v2902_v52 }
 0x1af   :  { %v2970_v12 = vsub.f32 %v2759_v48, %v2902_v52  ;;  %v2974_v25 = vsub.f32 %v3352_v27, %v2902_v52  ;;  %v2978_v31 = vsub.f32 %v3353_v20, %v2902_v52  ;;  %v2982_v22 = vsub.f32 %v3354_v19, %v2902_v52  ;;  %v3362_v27 = vld [vmem:[#allocation20_spill] sm:$0xff] }
 0x1b0   :  { %v2986_v28 = vsub.f32 %v3356_v23, %v2902_v52  ;;  %v2990_v48 = vsub.f32 %v3358_v35, %v2902_v52  ;;  %v2994_v39 = vsub.f32 %v3360_v4, %v2902_v52  ;;  %v2998_v20 = vsub.f32 %v3362_v27, %v2902_v52 }
 0x1b1   :  { %3355 = vst [vmem:[#allocation17_spill] sm:$0xff] %v2982_v22  ;;  %v3002_v19 = vsub.f32 %v3364_v16, %v2902_v52  ;;  %v3365_v22 = vld [vmem:[#allocation26_spill] sm:$0xff] }
 0x1b2   :  { %3357 = vst [vmem:[#allocation15_spill] sm:$0xff] %v2986_v28  ;;  %3359 = vst [vmem:[#allocation16_spill] sm:$0xff] %v2990_v48  ;;  %v3006_v23 = vsub.f32 %v3365_v22, %v2902_v52  ;;  %v3366_v28 = vld [vmem:[#allocation23_spill] sm:$0xff]  ;;  %v3367_v48 = vld [vmem:[#allocation25_spill] sm:$0xff]  ;;  %v3026_v22 = vsub.f32 %v2838_v51, %v2902_v52  ;;  %v3046_v51 = vsub.f32 %v2653_v45, %v2902_v52 }
 0x1b3   :  { %3361 = vst [vmem:[#allocation19_spill] sm:$0xff] %v2994_v39  ;;  %3363 = vst [vmem:[#allocation22_spill] sm:$0xff] %v2998_v20  ;;  %v3010_v35 = vsub.f32 %v3366_v28, %v2902_v52  ;;  %v3014_v4 = vsub.f32 %v3367_v48, %v2902_v52  ;;  %v3368_v39 = vld [vmem:[#allocation27_spill] sm:$0xff]  ;;  %v3369_v20 = vld [vmem:[#allocation28_spill] sm:$0xff]  ;;  %v3030_v28 = vsub.f32 %v2848_v62, %v2902_v52 }
 0x1b4   :  { %v3018_v27 = vsub.f32 %v3368_v39, %v2902_v52  ;;  %v3022_v16 = vsub.f32 %v3369_v20, %v2902_v52  ;;  %v3034_v48 = vsub.f32 %v2649_v43, %v2902_v52  ;;  %v3038_v39 = vsub.f32 %v2661_v49, %v2902_v52 }
 0x1b5   :  { %v3042_v20 = vsub.f32 %v2645_v41, %v2902_v52  ;;  %v3050_v62 = vsub.f32 %v2677_v58, %v2902_v52  ;;  %v3054_v43 = vsub.f32 %v2690_v1, %v2902_v52  ;;  %v3058_v49 = vsub.f32 %v2673_v56, %v2902_v52 }
 0x1b6   :  { %v3062_v41 = vsub.f32 %v2682_v61, %v2902_v52  ;;  %v3066_v45 = vsub.f32 %v2705_v10, %v2902_v52  ;;  %v3070_v58 = vsub.f32 %v2718_v17, %v2902_v52  ;;  %v3074_v1 = vsub.f32 %v2701_v8, %v2902_v52 }
 0x1b7   :  { %v3078_v56 = vsub.f32 %v2710_v13, %v2902_v52  ;;  %v3082_v61 = vsub.f32 %v2733_v26, %v2902_v52  ;;  %v3086_v10 = vsub.f32 %v2746_v33, %v2902_v52  ;;  %v3090_v17 = vsub.f32 %v2729_v24, %v2902_v52 }
 0x1b8   :  { %v3094_v8 = vsub.f32 %v2738_v29, %v2902_v52  ;;  %v3098_v13 = vsub.f32 %v2761_v50, %v2902_v52  ;;  %v3102_v26 = vsub.f32 %v2774_v0, %v2902_v52  ;;  %v3106_v33 = vsub.f32 %v2757_v46, %v2902_v52 }
 0x1b9   :  { %v3110_v24 = vsub.f32 %v2766_v53, %v2902_v52  ;;  %v3114_v29 = vsub.f32 %v2789_v18, %v2902_v52  ;;  %v3118_v50 = vsub.f32 %v2802_v32, %v2902_v52  ;;  %v3122_v0 = vsub.f32 %v2785_v14, %v2902_v52 }
 0x1ba   :  { %3370 = vst [vmem:[#allocation18_spill] sm:$0xff] %v3102_v26  ;;  %v3371_v26 = vld [vmem:[#allocation21_spill] sm:$0xff]  ;;  %v3130_v53 = vsub.f32 %v2817_v2, %v2902_v52  ;;  %v3134_v18 = vsub.f32 %v2830_v30, %v2902_v52  ;;  %v3138_v32 = vsub.f32 %v2813_v55, %v2902_v52  ;;  %v3142_v14 = vsub.f32 %v2822_v5, %v2902_v52 }
 0x1bb   :  { %v3126_v46 = vsub.f32 %v3371_v26, %v2902_v52  ;;  %v3146_v26 = vsub.f32 %v2845_v3, %v2902_v52  ;;  %v3150_v2 = vsub.f32 %v2858_v36, %v2902_v52  ;;  %v3154_v30 = vsub.f32 %v2841_v7, %v2902_v52 }
 0x1bc   :  { %3372 = vst [vmem:[#allocation20_spill] sm:$0xff] %v3142_v14  ;;  %v3158_v55 = vsub.f32 %v2850_v11, %v2902_v52  ;;  %v1449_v5 = vmul.f32 %v2906_v38, %v2906_v38  ;;  %v1450_v14 = vmul.f32 %v2910_v37, %v2910_v37  ;;  %v1451_v3 = vmul.f32 %v2914_v59, %v2914_v59 }
 0x1bd   :  { %3373 = vst [vmem:[#allocation24_spill] sm:$0xff] %v3146_v26  ;;  %v1452_v7 = vmul.f32 %v2918_v34, %v2918_v34 }
 0x1be   :  { %v1513_v26 = vadd.f32 %v1450_v14, %v1449_v5 }
 0x1c0   :  { %v1514_v36 = vadd.f32 %v1513_v26, %v1451_v3 }
 0x1c1   :  { %2536 = shalt.err (!%p2533_p6)
}
 0x1c2   :  { %s2537_s20 = scalar_lea.hbm %s3320_s4, 4096 }
 0x1c3   :  { %p2538_p7 = scmp.ne.s32.totalorder %s3320_s4, %s2537_s20  ;;  %p2541_p8 = scmp.lt.u32.totalorder %s2537_s20, %s3320_s4 }
 0x1c5   :  { %p2543_p9 = pnand %p2541_p8, %p2538_p7 }
 0x1c7   :  { %2546 = shalt.err (!%p2543_p9)
}
 0x1c8   :  { %1919 = dma.vmem_to_hbm [thread:$0]  %s1914_s16, 4096, %s3320_s4, [#allocation5], %s2578_s26, %s2578_s26, %s2579_s27   ;;  %v1453_v11 = vmul.f32 %v2922_v21, %v2922_v21  ;;  %v1515_v52 = vadd.f32 %v1514_v36, %v1452_v7  ;;  %v1454_v38 = vmul.f32 %v2926_v42, %v2926_v42  ;;  %v1455_v59 = vmul.f32 %v2930_v47, %v2930_v47 }
 0x1c9   :  { %v1456_v14 = vmul.f32 %v2934_v40, %v2934_v40  ;;  %v1457_v5 = vmul.f32 %v2938_v44, %v2938_v44  ;;  %v1458_v21 = vmul.f32 %v2942_v57, %v2942_v57  ;;  %v1459_v42 = vmul.f32 %v2946_v63, %v2946_v63  ;;  %s2582_s4 = smov [#allocation9]  }
 0x1ca   :  { %v1516_v37 = vadd.f32 %v1515_v52, %v1453_v11  ;;  %v1460_v47 = vmul.f32 %v2950_v54, %v2950_v54  ;;  %v1461_v40 = vmul.f32 %v2954_v60, %v2954_v60  ;;  %v1462_v44 = vmul.f32 %v2958_v9, %v2958_v9  ;;  %s1926_s25 = sshll.u32 %s2582_s4, 4  ;;  %s1927_s25 = int_to_ptr.vmem [resolvable:$true] %s1926_s25 }
 0x1cb   :  { %v1463_v57 = vmul.f32 %v2962_v15, %v2962_v15  ;;  %v1464_v63 = vmul.f32 %v2966_v6, %v2966_v6  ;;  %v1465_v54 = vmul.f32 %v2970_v12, %v2970_v12  ;;  %v1466_v60 = vmul.f32 %v2974_v25, %v2974_v25  ;;  %s2547_s26 = scalar_lea.vmem %s1927_s25, 128  ;;  %p2552_p11 = scmp.lt.s32.totalorder %s1927_s25, %s1927_s25 }
 0x1cc   :  { %v1517_v34 = vadd.f32 %v1516_v37, %v1454_v38  ;;  %v1467_v9 = vmul.f32 %v2978_v31, %v2978_v31  ;;  %p2548_p10 = scmp.ne.s32.totalorder %s1927_s25, %s2547_s26  ;;  %p2553_p12 = scmp.lt.s32.totalorder %s2547_s26, %s2547_s26 }
 0x1ce   :  { %v1518_v26 = vadd.f32 %v1517_v34, %v1455_v59  ;;  %p2554_p13 = por %p2553_p12, %p2552_p11 }
 0x1d0   :  { %v1519_v3 = vadd.f32 %v1518_v26, %v1456_v14  ;;  %p2555_p0 = pnand %p2554_p13, %p2548_p10 }
 0x1d2   :  { %v1520_v7 = vadd.f32 %v1519_v3, %v1457_v5  ;;  %v3374_v5 = vld [vmem:[#allocation17_spill] sm:$0xff] }
 0x1d3   :  { %v1468_v15 = vmul.f32 %v3374_v5, %v3374_v5 }
 0x1d4   :  { %v1521_v36 = vadd.f32 %v1520_v7, %v1458_v21  ;;  %v3375_v21 = vld [vmem:[#allocation15_spill] sm:$0xff] }
 0x1d5   :  { %v1469_v6 = vmul.f32 %v3375_v21, %v3375_v21 }
 0x1d6   :  { %v1522_v11 = vadd.f32 %v1521_v36, %v1459_v42  ;;  %v3376_v42 = vld [vmem:[#allocation16_spill] sm:$0xff] }
 0x1d7   :  { %v1470_v12 = vmul.f32 %v3376_v42, %v3376_v42 }
 0x1d8   :  { %v1523_v52 = vadd.f32 %v1522_v11, %v1460_v47  ;;  %v3377_v47 = vld [vmem:[#allocation19_spill] sm:$0xff] }
 0x1d9   :  { %v1471_v25 = vmul.f32 %v3377_v47, %v3377_v47 }
 0x1da   :  { %v1524_v38 = vadd.f32 %v1523_v52, %v1461_v40  ;;  %v3378_v40 = vld [vmem:[#allocation22_spill] sm:$0xff] }
 0x1db   :  { %v1472_v31 = vmul.f32 %v3378_v40, %v3378_v40 }
 0x1dc   :  { %v1525_v37 = vadd.f32 %v1524_v38, %v1462_v44  ;;  %v1473_v44 = vmul.f32 %v3002_v19, %v3002_v19  ;;  %v1478_v19 = vmul.f32 %v3022_v16, %v3022_v16  ;;  %v1483_v16 = vmul.f32 %v3042_v20, %v3042_v20 }
 0x1dd   :  { %v1488_v20 = vmul.f32 %v3062_v41, %v3062_v41  ;;  %v1493_v41 = vmul.f32 %v3082_v61, %v3082_v61 }
 0x1de   :  { %v1526_v59 = vadd.f32 %v1525_v37, %v1463_v57  ;;  %v1474_v57 = vmul.f32 %v3006_v23, %v3006_v23  ;;  %v1479_v23 = vmul.f32 %v3026_v22, %v3026_v22  ;;  %v1484_v22 = vmul.f32 %v3046_v51, %v3046_v51 }
 0x1df   :  { %v1489_v51 = vmul.f32 %v3066_v45, %v3066_v45  ;;  %v1494_v45 = vmul.f32 %v3086_v10, %v3086_v10  ;;  %v1499_v10 = vmul.f32 %v3106_v33, %v3106_v33  ;;  %v1504_v33 = vmul.f32 %v3126_v46, %v3126_v46 }
 0x1e0   :  { %v1527_v34 = vadd.f32 %v1526_v59, %v1464_v63  ;;  %v1475_v63 = vmul.f32 %v3010_v35, %v3010_v35  ;;  %v1480_v35 = vmul.f32 %v3030_v28, %v3030_v28  ;;  %v1485_v28 = vmul.f32 %v3050_v62, %v3050_v62 }
 0x1e1   :  { %v1490_v62 = vmul.f32 %v3070_v58, %v3070_v58  ;;  %v1495_v58 = vmul.f32 %v3090_v17, %v3090_v17  ;;  %v1500_v17 = vmul.f32 %v3110_v24, %v3110_v24  ;;  %v1505_v24 = vmul.f32 %v3130_v53, %v3130_v53 }
 0x1e2   :  { %v1528_v14 = vadd.f32 %v1527_v34, %v1465_v54  ;;  %v1476_v54 = vmul.f32 %v3014_v4, %v3014_v4  ;;  %v1481_v4 = vmul.f32 %v3034_v48, %v3034_v48  ;;  %v1486_v48 = vmul.f32 %v3054_v43, %v3054_v43 }
 0x1e3   :  { %v1491_v43 = vmul.f32 %v3074_v1, %v3074_v1  ;;  %v1496_v1 = vmul.f32 %v3094_v8, %v3094_v8  ;;  %v1501_v8 = vmul.f32 %v3114_v29, %v3114_v29  ;;  %v1506_v29 = vmul.f32 %v3134_v18, %v3134_v18 }
 0x1e4   :  { %v1529_v26 = vadd.f32 %v1528_v14, %v1466_v60  ;;  %v1477_v60 = vmul.f32 %v3018_v27, %v3018_v27  ;;  %v1482_v27 = vmul.f32 %v3038_v39, %v3038_v39  ;;  %v1487_v39 = vmul.f32 %v3058_v49, %v3058_v49 }
 0x1e5   :  { %v1492_v49 = vmul.f32 %v3078_v56, %v3078_v56  ;;  %v1497_v56 = vmul.f32 %v3098_v13, %v3098_v13  ;;  %v1502_v13 = vmul.f32 %v3118_v50, %v3118_v50  ;;  %v1507_v50 = vmul.f32 %v3138_v32, %v3138_v32 }
 0x1e6   :  { %v1530_v3 = vadd.f32 %v1529_v26, %v1467_v9  ;;  %v1510_v53 = vmul.f32 %v3150_v2, %v3150_v2  ;;  %v1511_v18 = vmul.f32 %v3154_v30, %v3154_v30  ;;  %v1512_v32 = vmul.f32 %v3158_v55, %v3158_v55 }
 0x1e8   :  { %v1531_v7 = vadd.f32 %v1530_v3, %v1468_v15 }
 0x1ea   :  { %v1532_v36 = vadd.f32 %v1531_v7, %v1469_v6 }
 0x1ec   :  { %v1533_v11 = vadd.f32 %v1532_v36, %v1470_v12 }
 0x1ee   :  { %v1534_v52 = vadd.f32 %v1533_v11, %v1471_v25 }
 0x1f0   :  { %v1535_v38 = vadd.f32 %v1534_v52, %v1472_v31 }
 0x1f2   :  { %v1536_v37 = vadd.f32 %v1535_v38, %v1473_v44 }
 0x1f4   :  { %v1537_v59 = vadd.f32 %v1536_v37, %v1474_v57  ;;  %v3379_v37 = vld [vmem:[#allocation18_spill] sm:$0xff] }
 0x1f5   :  { %v1498_v61 = vmul.f32 %v3379_v37, %v3379_v37 }
 0x1f6   :  { %v1538_v34 = vadd.f32 %v1537_v59, %v1475_v63 }
 0x1f8   :  { %v1539_v14 = vadd.f32 %v1538_v34, %v1476_v54 }
 0x1fa   :  { %v1540_v9 = vadd.f32 %v1539_v14, %v1477_v60  ;;  %v1503_v14 = vmul.f32 %v3122_v0, %v3122_v0 }
 0x1fc   :  { %v1541_v26 = vadd.f32 %v1540_v9, %v1478_v19 }
 0x1fe   :  { %v1542_v5 = vadd.f32 %v1541_v26, %v1479_v23 }
 0x200   :  { %v1543_v15 = vadd.f32 %v1542_v5, %v1480_v35  ;;  %v3380_v5 = vld [vmem:[#allocation20_spill] sm:$0xff] }
 0x201   :  { %v1508_v0 = vmul.f32 %v3380_v5, %v3380_v5 }
 0x202   :  { %v1544_v3 = vadd.f32 %v1543_v15, %v1481_v4  ;;  %v3381_v15 = vld [vmem:[#allocation24_spill] sm:$0xff] }
 0x203   :  { %v1509_v46 = vmul.f32 %v3381_v15, %v3381_v15 }
 0x204   :  { %v1545_v21 = vadd.f32 %v1544_v3, %v1482_v27 }
 0x206   :  { %v1546_v6 = vadd.f32 %v1545_v21, %v1483_v16 }
 0x208   :  { %v1547_v7 = vadd.f32 %v1546_v6, %v1484_v22 }
 0x20a   :  { %v1548_v42 = vadd.f32 %v1547_v7, %v1485_v28  ;;  %v991_v28 = vlaneseq }
 0x20c   :  { %v1549_v12 = vadd.f32 %v1548_v42, %v1486_v48  ;;  %v992_v42 = vshrl.u32 %v991_v28, 7 }
 0x20e   :  { %v1550_v36 = vadd.f32 %v1549_v12, %v1487_v39  ;;  %vm1582_vm0 = vcmp.eq.s32.totalorder %v992_v42, 0  ;;  %vm1584_vm1 = vcmp.eq.s32.totalorder %v992_v42, 1 }
 0x210   :  { %v1551_v47 = vadd.f32 %v1550_v36, %v1488_v20  ;;  %v3382_v20 = vld [vmem:[#allocation29_spill] sm:$0xff] }
 0x211   :  { %v1583_v30 = vsel %vm1582_vm0, %v3382_v20, 0.0 }
 0x212   :  { %v1552_v25 = vadd.f32 %v1551_v47, %v1489_v51 }
 0x214   :  { %v1553_v11 = vadd.f32 %v1552_v25, %v1490_v62 }
 0x216   :  { %v1554_v40 = vadd.f32 %v1553_v11, %v1491_v43 }
 0x218   :  { %v1555_v31 = vadd.f32 %v1554_v40, %v1492_v49 }
 0x21a   :  { %v1556_v52 = vadd.f32 %v1555_v31, %v1493_v41 }
 0x21c   :  { %v1557_v44 = vadd.f32 %v1556_v52, %v1494_v45 }
 0x21e   :  { %v1558_v38 = vadd.f32 %v1557_v44, %v1495_v58 }
 0x220   :  { %v1559_v57 = vadd.f32 %v1558_v38, %v1496_v1 }
 0x222   :  { %v1560_v63 = vadd.f32 %v1559_v57, %v1497_v56 }
 0x224   :  { %v1561_v59 = vadd.f32 %v1560_v63, %v1498_v61 }
 0x226   :  { %v1562_v54 = vadd.f32 %v1561_v59, %v1499_v10 }
 0x228   :  { %v1563_v34 = vadd.f32 %v1562_v54, %v1500_v17 }
 0x22a   :  { %v1564_v60 = vadd.f32 %v1563_v34, %v1501_v8 }
 0x22c   :  { %v1565_v19 = vadd.f32 %v1564_v60, %v1502_v13 }
 0x22e   :  { %v1566_v9 = vadd.f32 %v1565_v19, %v1503_v14 }
 0x230   :  { %v1567_v23 = vadd.f32 %v1566_v9, %v1504_v33 }
 0x232   :  { %v1568_v26 = vadd.f32 %v1567_v23, %v1505_v24 }
 0x234   :  { %v1569_v35 = vadd.f32 %v1568_v26, %v1506_v29 }
 0x236   :  { %v1570_v4 = vadd.f32 %v1569_v35, %v1507_v50 }
 0x238   :  { %v1571_v27 = vadd.f32 %v1570_v4, %v1508_v0 }
 0x23a   :  { %v1572_v3 = vadd.f32 %v1571_v27, %v1509_v46 }
 0x23c   :  { %v1573_v16 = vadd.f32 %v1572_v3, %v1510_v53 }
 0x23e   :  { %v1574_v21 = vadd.f32 %v1573_v16, %v1511_v18 }
 0x240   :  { %v1575_v22 = vadd.f32 %v1574_v21, %v1512_v32 }
 0x242   :  { %v1576_v6 = vrot.slane %v1575_v22, 4 }
 0x244   :  { %v1577_v7 = vadd.f32 %v1576_v6, %v1575_v22 }
 0x246   :  { %v1578_v48 = vrot.slane %v1577_v7, 2 }
 0x248   :  { %v1579_v39 = vadd.f32 %v1578_v48, %v1577_v7 }
 0x24a   :  { %v1580_v12 = vrot.slane %v1579_v39, 1 }
 0x24c   :  { %v1581_v2 = vadd.f32 %v1580_v12, %v1579_v39 }
 0x24e   :  { %v1585_v36 = vsel %vm1584_vm1, %v1581_v2, 0.0 }
 0x24f   :  { %v1586_v51 = vadd.f32 %v1585_v36, %v1583_v30 }
 0x251   :  { %1587 = vst [vmem:[#allocation9] sm:$0xff] %v1586_v51 }
 0x252   :  { %2558 = shalt.err (!%p2555_p0)
}
 0x253   :  { %s2559_s29 = scalar_lea.hbm %s3321_s5, 128 }
 0x254   :  { %p2560_p1 = scmp.ne.s32.totalorder %s3321_s5, %s2559_s29  ;;  %p2563_p2 = scmp.lt.u32.totalorder %s2559_s29, %s3321_s5 }
 0x256   :  { %p2565_p3 = pnand %p2563_p2, %p2560_p1 }
 0x258   :  { %2568 = shalt.err (!%p2565_p3)
}
 0x259   :  { %1929 = dma.vmem_to_hbm [thread:$0]  %s1927_s25, 128, %s3321_s5, [#allocation10]  }
 0x25a   :  { %2573 = dma.done.wait [#allocation5], 4096  }
 0x25b   :  { %2574 = vsyncadd [#allocation5], 4294963200 }
 0x25c   :  { %2575 = dma.done.wait [#allocation10], 128  }
 0x25d   :  { %2576 = vsyncadd [#allocation10], 4294967168 }
 0x25e   :  { %1936 = vsyncpa [#allocation4], 1 }
 0x25f   :  { %1937 = vsyncpa [#allocation7], 1 }
 0x260   :  { %1938 = vsyncpa [#allocation5], 1 }
 0x261   :  { %1939 = vsyncpa [#allocation10], 1 }

</bundles_post_ra>
